<compile_context>
chip_gen: v7x
topology: tpu7x:2x2x1
jax: 0.10.0
libtpu: 0.0.40
codegen_flags: <defaults>
</compile_context>

<pallas_src>
import functools

import jax
import jax.numpy as jnp
from jax.experimental import pallas as pl
from jax.experimental.pallas import tpu as pltpu


def _round_up(x, m):
    return ((x + m - 1) // m) * m


def _as_pair(v):
    return (v, v) if isinstance(v, int) else tuple(v)


# --------------------------------------------------------------------------- Pallas kernel
def _gated_conv_kernel(x_ref, w_ref, b_ref, out_ref, *, co_pad):
    # x_ref  : (1, K, tN)      im2col'd input tile (K = kH*kW*Ci, tN multiple of 128)
    # w_ref  : (2*co_pad, K)   stacked [conv ; gate_conv] weights (resident, constant index map)
    # b_ref  : (2*co_pad, 1)   stacked biases
    # out_ref: (1, co_pad, tN)
    x = x_ref[0].astype(jnp.float32)                        # (K, tN)
    w = w_ref[...].astype(jnp.float32)                      # (2*co_pad, K)
    # One fused MXU matmul covers both conv branches and all kernel taps.
    y = jnp.dot(w, x, preferred_element_type=jnp.float32)   # (2*co_pad, tN)
    y = y + b_ref[...].astype(jnp.float32)
    main = y[:co_pad]                                        # sublane-aligned split
    gate = y[co_pad:]
    sig = 1.0 / (1.0 + jnp.exp(-gate))                       # exp on EUP; saturates correctly
    out_ref[0] = (main * sig).astype(out_ref.dtype)


# --------------------------------------------------------------------------- gated VALID conv
def _gated_conv2d(xpad, w_main, b_main, w_gate, b_gate, stride):
    """conv(xpad) * sigmoid(gate_conv(xpad)) with 'VALID' padding; returns (B, Co, Ho, Wo)."""
    B, Ci, Hp, Wp = xpad.shape
    Co, _, kH, kW = w_main.shape
    sH, sW = stride
    Ho = (Hp - kH) // sH + 1
    Wo = (Wp - kW) // sW + 1
    assert Ho > 0 and Wo > 0

    # im2col: one strided slice per tap (wrapper-side layout plumbing, not compute).
    taps = []
    for i in range(kH):
        for j in range(kW):
            taps.append(jax.lax.slice(
                xpad, (0, 0, i, j),
                (B, Ci, i + (Ho - 1) * sH + 1, j + (Wo - 1) * sW + 1),
                (1, 1, sH, sW)))                              # (B, Ci, Ho, Wo)
    K = kH * kW * Ci
    N = Ho * Wo
    x_col = jnp.stack(taps, axis=1).reshape(B, K, N)          # K ordered as (i, j, ci)

    # Lane-dense tiling of the flattened spatial dim.
    tile_n = min(2048, _round_up(N, 128))
    n_pad = _round_up(N, tile_n)
    if n_pad != N:
        x_col = jnp.pad(x_col, ((0, 0), (0, 0), (0, n_pad - N)))

    # Stack both branches' weights / biases; pad Co to a sublane multiple.
    co_pad = _round_up(Co, 8)

    def flat_w(w):                                            # (Co, Ci, kH, kW) -> (co_pad, K)
        wf = jnp.transpose(w, (0, 2, 3, 1)).reshape(Co, K)
        return jnp.pad(wf, ((0, co_pad - Co), (0, 0)))

    def flat_b(b):
        return jnp.pad(b.reshape(Co, 1), ((0, co_pad - Co), (0, 0)))

    w_all = jnp.concatenate([flat_w(w_main), flat_w(w_gate)], axis=0)   # (2*co_pad, K)
    b_all = jnp.concatenate([flat_b(b_main), flat_b(b_gate)], axis=0)   # (2*co_pad, 1)

    grid = (B, n_pad // tile_n)
    out = pl.pallas_call(
        functools.partial(_gated_conv_kernel, co_pad=co_pad),
        out_shape=jax.ShapeDtypeStruct((B, co_pad, n_pad), jnp.float32),
        grid_spec=pltpu.PrefetchScalarGridSpec(
            num_scalar_prefetch=0,
            grid=grid,
            in_specs=[
                pl.BlockSpec((1, K, tile_n), lambda b, n: (b, 0, n)),
                pl.BlockSpec((2 * co_pad, K), lambda b, n: (0, 0)),
                pl.BlockSpec((2 * co_pad, 1), lambda b, n: (0, 0)),
            ],
            out_specs=pl.BlockSpec((1, co_pad, tile_n), lambda b, n: (b, 0, n)),
        ),
        compiler_params=pltpu.CompilerParams(
            dimension_semantics=("parallel", "parallel")),
    )(x_col, w_all, b_all)

    return out[:, :Co, :N].reshape(B, Co, Ho, Wo)


# --------------------------------------------------------------------------- Gate_2dconv forward
def gate_2dconv(x, params, *, kernel_size, stride, de_flag, pad=(0, 0, 0, 0), chomp=1):
    """Forward pass of Gate_2dconv.  x: (B, C_in, H, W) float32.

    de_flag=False: params['w'],'gw' are Conv2d weights (Co, Ci, kH, kW).
    de_flag=True : params['w'],'gw' are ConvTranspose2d weights (Ci, Co, kH, kW).
    """
    kH, kW = _as_pair(kernel_size)
    sH, sW = _as_pair(stride)

    if not de_flag:
        pad_l, pad_r, pad_t, pad_b = pad      # nn.ConstantPad2d order: (left, right, top, bottom)
        xpad = jnp.pad(x, ((0, 0), (0, 0), (pad_t, pad_b), (pad_l, pad_r)))
        return _gated_conv2d(xpad, params['w'], params['b'],
                             params['gw'], params['gb'], (sH, sW))

    # ConvTranspose2d (padding=0, output_padding=0) == stride-1 conv over the zero-dilated
    # input with flipped kernels; Chomp_T (a slice) commutes with the elementwise gate.
    B, Ci, H, W = x.shape
    x_up = jnp.zeros((B, Ci, (H - 1) * sH + 1, (W - 1) * sW + 1), x.dtype)
    x_up = x_up.at[:, :, ::sH, ::sW].set(x)
    xpad = jnp.pad(x_up, ((0, 0), (0, 0), (kH - 1, kH - 1), (kW - 1, kW - 1)))

    def to_fwd_w(wt):                         # (Ci, Co, kH, kW) -> (Co, Ci, kH, kW), spatially flipped
        return jnp.transpose(wt, (1, 0, 2, 3))[:, :, ::-1, ::-1]

    y = _gated_conv2d(xpad, to_fwd_w(params['w']), params['b'],
                      to_fwd_w(params['gw']), params['gb'], (1, 1))
    return y[:, :, 0:y.shape[2] - chomp, :]   # Chomp_T


# --------------------------------------------------------------------------- pure-JAX reference
def _ref_conv2d(xpad, w, b, stride):
    out = jax.lax.conv_general_dilated(
        xpad, w, window_strides=stride, padding='VALID',
        dimension_numbers=('NCHW', 'OIHW', 'NCHW'),
        precision=jax.lax.Precision.HIGHEST)
    return out + b[None, :, None, None]


def _ref_conv_transpose2d(x, w_t, b, stride):
    # Direct scatter-add definition of ConvTranspose2d (padding=0, output_padding=0).
    B, Ci, H, W = x.shape
    _, Co, kH, kW = w_t.shape
    sH, sW = stride
    Ht, Wt = (H - 1) * sH + kH, (W - 1) * sW + kW
    out = jnp.zeros((B, Co, Ht, Wt), jnp.float32)
    for i in range(kH):
        for j in range(kW):
            contrib = jnp.einsum('co,bchw->bohw', w_t[:, :, i, j], x,
                                 precision=jax.lax.Precision.HIGHEST)
            out = out.at[:, :, i:i + (H - 1) * sH + 1:sH,
                         j:j + (W - 1) * sW + 1:sW].add(contrib)
    return out + b[None, :, None, None]


def _ref_gate_2dconv(x, params, *, kernel_size, stride, de_flag, pad=(0, 0, 0, 0), chomp=1):
    s = _as_pair(stride)
    if not de_flag:
        pad_l, pad_r, pad_t, pad_b = pad
        xpad = jnp.pad(x, ((0, 0), (0, 0), (pad_t, pad_b), (pad_l, pad_r)))
        a = _ref_conv2d(xpad, params['w'], params['b'], s)
        g = _ref_conv2d(xpad, params['gw'], params['gb'], s)
        return a * jax.nn.sigmoid(g)
    a = _ref_conv_transpose2d(x, params['w'], params['b'], s)[:, :, 0:-chomp, :]
    g = _ref_conv_transpose2d(x, params['gw'], params['gb'], s)[:, :, 0:-chomp, :]
    return a * jax.nn.sigmoid(g)


# --------------------------------------------------------------------------- test
if __name__ == "__main__":
    key = jax.random.PRNGKey(0)
    ks = jax.random.split(key, 10)

    # de_flag = False : pad -> Conv2d, gated by pad -> Conv2d -> Sigmoid
    B, Ci, Co, H, W = 2, 4, 8, 16, 16
    ksize, stride, pad = (2, 3), (1, 2), (1, 1, 1, 0)
    x = jax.random.normal(ks[0], (B, Ci, H, W), jnp.float32)
    params = dict(
        w=jax.random.normal(ks[1], (Co, Ci, *ksize), jnp.float32) * 0.3,
        b=jax.random.normal(ks[2], (Co,), jnp.float32) * 0.1,
        gw=jax.random.normal(ks[3], (Co, Ci, *ksize), jnp.float32) * 0.3,
        gb=jax.random.normal(ks[4], (Co,), jnp.float32) * 0.1,
    )
    out = gate_2dconv(x, params, kernel_size=ksize, stride=stride, de_flag=False, pad=pad)
    out = jax.block_until_ready(out)
    ref = _ref_gate_2dconv(x, params, kernel_size=ksize, stride=stride, de_flag=False, pad=pad)
    assert out.shape == ref.shape
    assert jnp.allclose(out, ref, atol=2e-4, rtol=2e-4), float(jnp.max(jnp.abs(out - ref)))

    # de_flag = True : ConvTranspose2d -> Chomp_T, gated by ConvTranspose2d -> Chomp_T -> Sigmoid
    B2, Ci2, Co2, H2, W2 = 2, 6, 5, 8, 5
    ksize2, stride2, chomp = (2, 3), (1, 2), 1
    x2 = jax.random.normal(ks[5], (B2, Ci2, H2, W2), jnp.float32)
    params2 = dict(
        w=jax.random.normal(ks[6], (Ci2, Co2, *ksize2), jnp.float32) * 0.3,
        b=jax.random.normal(ks[7], (Co2,), jnp.float32) * 0.1,
        gw=jax.random.normal(ks[8], (Ci2, Co2, *ksize2), jnp.float32) * 0.3,
        gb=jax.random.normal(ks[9], (Co2,), jnp.float32) * 0.1,
    )
    out2 = gate_2dconv(x2, params2, kernel_size=ksize2, stride=stride2, de_flag=True, chomp=chomp)
    out2 = jax.block_until_ready(out2)
    ref2 = _ref_gate_2dconv(x2, params2, kernel_size=ksize2, stride=stride2, de_flag=True, chomp=chomp)
    assert out2.shape == ref2.shape
    assert jnp.allclose(out2, ref2, atol=2e-4, rtol=2e-4), float(jnp.max(jnp.abs(out2 - ref2)))

    print("KERNEL_OK")
</pallas_src>

<mosaic_0001>
module attributes {stable_mosaic.version = 11 : i64} {
  func.func @_gated_conv_kernel(%arg0: i32, %arg1: i32, %arg2: memref<1x24x128xf32, #tpu.memory_space<vmem>>, %arg3: memref<16x24xf32, #tpu.memory_space<vmem>>, %arg4: memref<16x1xf32, #tpu.memory_space<vmem>>, %arg5: memref<1x8x128xf32, #tpu.memory_space<vmem>>) attributes {dimension_semantics = [#tpu.dimension_semantics<parallel>, #tpu.dimension_semantics<parallel>], iteration_bounds = array<i64: 2, 1>, scalar_prefetch = 0 : i64, scratch_operands = 0 : i64, tpu.core_type = #tpu.core_type<tc>, window_params = [{transform_indices = @transform_0, window_bounds = array<i64: 1, 24, 128>}, {pipeline_mode = #tpu.pipeline_mode<synchronous>, transform_indices = @transform_1, window_bounds = array<i64: 16, 24>}, {pipeline_mode = #tpu.pipeline_mode<synchronous>, transform_indices = @transform_2, window_bounds = array<i64: 16, 1>}, {transform_indices = @transform_3, window_bounds = array<i64: 1, 8, 128>}]} {
    %c0 = arith.constant 0 : index
    %c0_0 = arith.constant 0 : index
    %c0_1 = arith.constant 0 : index
    %0 = vector.load %arg2[%c0, %c0_0, %c0_1] : memref<1x24x128xf32, #tpu.memory_space<vmem>>, vector<1x24x128xf32>
    %1 = vector.shape_cast %0 : vector<1x24x128xf32> to vector<24x128xf32>
    %c0_2 = arith.constant 0 : index
    %c0_3 = arith.constant 0 : index
    %2 = vector.load %arg3[%c0_2, %c0_3] : memref<16x24xf32, #tpu.memory_space<vmem>>, vector<16x24xf32>
    %cst = arith.constant dense<0.000000e+00> : vector<16x128xf32>
    %3 = tpu.matmul %2, %1, %cst {dimension_numbers = #tpu.dot_dimension_numbers<[1], [0], [0], [1], [0, 0, 1, 1], [], []>} : vector<16x24xf32>, vector<24x128xf32>, vector<16x128xf32> -> vector<16x128xf32>
    %c0_4 = arith.constant 0 : index
    %c0_5 = arith.constant 0 : index
    %4 = vector.load %arg4[%c0_4, %c0_5] : memref<16x1xf32, #tpu.memory_space<vmem>>, vector<16x1xf32>
    %5 = vector.broadcast %4 : vector<16x1xf32> to vector<16x128xf32>
    %6 = arith.addf %3, %5 : vector<16x128xf32>
    %7 = vector.extract_strided_slice %6 {offsets = [0, 0], sizes = [8, 128], strides = [1, 1]} : vector<16x128xf32> to vector<8x128xf32>
    %8 = vector.extract_strided_slice %6 {offsets = [8, 0], sizes = [8, 128], strides = [1, 1]} : vector<16x128xf32> to vector<8x128xf32>
    %cst_6 = arith.constant 0.000000e+00 : f32
    %9 = vector.broadcast %cst_6 : f32 to vector<8x128xf32>
    %10 = arith.subf %9, %8 : vector<8x128xf32>
    %11 = math.exp %10 : vector<8x128xf32>
    %cst_7 = arith.constant 1.000000e+00 : f32
    %12 = vector.broadcast %cst_7 : f32 to vector<8x128xf32>
    %13 = arith.addf %12, %11 : vector<8x128xf32>
    %cst_8 = arith.constant 1.000000e+00 : f32
    %14 = vector.broadcast %cst_8 : f32 to vector<8x128xf32>
    %15 = arith.divf %14, %13 : vector<8x128xf32>
    %16 = arith.mulf %7, %15 : vector<8x128xf32>
    %c0_9 = arith.constant 0 : index
    %c0_10 = arith.constant 0 : index
    %c0_11 = arith.constant 0 : index
    %17 = vector.load %arg5[%c0_9, %c0_10, %c0_11] : memref<1x8x128xf32, #tpu.memory_space<vmem>>, vector<1x8x128xf32>
    %18 = vector.shape_cast %17 : vector<1x8x128xf32> to vector<8x128xf32>
    %19 = vector.shape_cast %16 : vector<8x128xf32> to vector<1x8x128xf32>
    tpu.vector_store %arg5[%c0_9, %c0_10, %c0_11], %19 {strides = array<i32>} : memref<1x8x128xf32, #tpu.memory_space<vmem>>, vector<1x8x128xf32>,
    return
  }
  func.func @transform_0(%arg0: i32, %arg1: i32) -> (i32, i32, i32) {
    %c0_i32 = arith.constant 0 : i32
    %c0_i32_0 = arith.constant 0 : i32
    return %arg0, %c0_i32, %arg1 : i32, i32, i32
  }
  func.func @transform_1(%arg0: i32, %arg1: i32) -> (i32, i32) {
    %c0_i32 = arith.constant 0 : i32
    %c0_i32_0 = arith.constant 0 : i32
    %c0_i32_1 = arith.constant 0 : i32
    return %c0_i32, %c0_i32_0 : i32, i32
  }
  func.func @transform_2(%arg0: i32, %arg1: i32) -> (i32, i32) {
    %c0_i32 = arith.constant 0 : i32
    %c0_i32_0 = arith.constant 0 : i32
    %c0_i32_1 = arith.constant 0 : i32
    return %c0_i32, %c0_i32_0 : i32, i32
  }
  func.func @transform_3(%arg0: i32, %arg1: i32) -> (i32, i32, i32) {
    %c0_i32 = arith.constant 0 : i32
    %c0_i32_0 = arith.constant 0 : i32
    return %arg0, %c0_i32, %arg1 : i32, i32, i32
  }
}

</mosaic_0001>

<bundles_post_ra>
// kernel: tpu_custom_call.1
= control target key start
LH: loop header
LB: loop body
LE: loop exit
PB: predicated region body
PF: predicated region fallthrough
CT: control target
= control target key end

     0   :  { %8 = vsyncpa [#allocation3], 0  ;;  %s840_s0 = inlined_call_operand.hbm [shape: f32[2,24,128], index: 0, kind: input, shape index: {}]   ;;  %s841_s1 = inlined_call_operand.vmem [shape: f32[16,24], index: 1, kind: input, shape index: {}]   ;;  %s842_s2 = inlined_call_operand.vmem [shape: f32[16,1], index: 2, kind: input, shape index: {}]   ;;  %s843_s3 = inlined_call_operand.hbm [shape: f32[2,8,128], index: 3, kind: output, shape index: {}]  }
   0x1   :  { %10 = vsyncpa [#allocation3 + $0x1], 0 }
   0x2   :  { %11 = vsyncpa [#allocation4], 0 }
   0x3   :  { %13 = vsyncpa [#allocation4 + $0x1], 0  ;;  %s652_s12 = smov 0   ;;  %s654_s13 = smov 0  }
   0x4   :  { %s656_s14 = smov 0   ;;  %s658_s15 = smov 0  }
   0x5   :  { %s660_s16 = smov 0   ;;  %s662_s17 = smov 0  }
   0x6 LB: > { %s409_s18 = sadd.s32 4294967295, %s625_s17   ;;  %s410_s19 = sadd.s32 4294967294, %s625_s17   ;;  %s625_s17 = sphi %s662_s17, %s19_s17   ;;  %s621_s16 = sphi %s660_s16, %s858_s16   ;;  %s617_s15 = sphi %s658_s15, %s857_s15   ;;  %s613_s14 = sphi %s656_s14, %s856_s14   ;;  %s609_s13 = sphi %s654_s13, %s855_s13   ;;  %s605_s12 = sphi %s652_s12, %s854_s12  }
   0x7   : > { %s31_s20 = sadd.s32 1, %s621_s16  ;;  %s40_s21 = sadd.s32 1, %s613_s14 }
   0x8   : > { %p33_p0 = scmp.ge.s32.totalorder %s31_s20, 2  ;;  %p47_p1 = scmp.ne.s32.totalorder %s613_s14, %s609_s13 }
   0x9   : > { %p48_p2 = scmp.eq.s32.totalorder %s625_s17, 0  ;;  %p53_p3 = scmp.ne.s32.totalorder %s609_s13, %s605_s12 }
   0xa   : > { %s860_s20 = smov (%p33_p0, %s31_s20), 0  ;;  %p54_p5 = scmp.eq.s32.totalorder %s409_s18, 0 }
   0xb   : > { %p693_p4 = por %p48_p2, %p47_p1  ;;  %s35_s23 = ssub.s32 %s621_s16, %s860_s20 }
   0xc   : > { %p121_p6 = scmp.eq.s32.totalorder %s409_s18, 1  ;;  %p38_p7 = scmp.eq.s32.totalorder %s35_s23, 0 }
   0xd   : > { %p699_p8 = por %p54_p5, %p53_p3  ;;  %p127_p10 = scmp.eq.s32.totalorder %s410_s19, 1 }
   0xe   : > { %p703_p9 = por %p121_p6, %p47_p1  ;;  %p455_p13 = scmp.lt.s32.totalorder %s625_s17, 2 }
   0xf   : > { %s708_s26 = scalar_select %p38_p7, %s613_s14, %s40_s21  }
  0x10   : > { %s847_s25 = scalar_select %p703_p9, 1, 0 }
  0x11   : > { %p710_p11 = por %p127_p10, %p53_p3  ;;  %s153_s28 = sand.u32 1, %s613_s14  }
  0x12   : > { %s440_s29 = smul.u32 24, %s153_s28  ;;  %p720_p0 = pnand %p455_p13, %p693_p4 }
  0x13   : > { %s848_s27 = scalar_select %p710_p11, 1, 0 }
  0x14   : > { %s441_s30 = smul.u32 384, %s621_s16  ;;  %s157_s8 = scalar_lea.vmem [#allocation2], %s440_s29 }
  0x15   : > { %s165_s9 = sshll.u32 %s157_s8, 4  ;;  %s732_s10 = scalar_lea.sflag [#allocation3], %s153_s28  ;;  %s729_s9 = int_to_ptr.vmem [resolvable:$true] %s165_s9 }
  0x16   : > { %s727_s7 = scalar_lea.hbm %s840_s0, %s441_s30  ;;  %p515_p3 = pneg %p720_p0 }
  0x17   : > { %s513_s11 = scalar_lea.hbm %s727_s7, 384  ;;  %s518_s21 = scalar_lea.hbm %s840_s0, 768 }
  0x18   : > { %p514_p2 = scmp.ne.s32.totalorder %s727_s7, %s513_s11  ;;  %p519_p6 = scmp.lt.u32.totalorder %s727_s7, %s840_s0 }
  0x19   : > { %p520_p7 = scmp.lt.u32.totalorder %s518_s21, %s513_s11  ;;  %p522_p13 = scmp.lt.u32.totalorder %s513_s11, %s727_s7 }
  0x1a   : > { %p516_p4 = pnand %p515_p3, %p514_p2 }
  0x1b   : > { %p521_p10 = por %p520_p7, %p519_p6 }
  0x1c   : > { %p517_p5 = pneg %p516_p4 }
  0x1d   : > { %p523_p12 = por %p522_p13, %p521_p10 }
  0x1f   : > { %p524_p1 = pnand %p523_p12, %p517_p5 }
  0x21   : > { %527 = shalt.err (!%p524_p1)
}
  0x22   : > { %s528_s28 = scalar_lea.vmem %s729_s9, 384  ;;  %s627_s29 = smov [#allocation2]  }
  0x23   : > { %p529_p2 = scmp.ne.s32.totalorder %s729_s9, %s528_s28  ;;  %s533_s30 = sshll.u32 %s627_s29, 4  ;;  %s534_s30 = int_to_ptr.vmem [resolvable:$false] %s533_s30 }
  0x24   : > { %s535_s5 = scalar_lea.vmem %s534_s30, 768  ;;  %p536_p9 = scmp.lt.s32.totalorder %s729_s9, %s534_s30 }
  0x25   : > { %p531_p4 = pnand %p529_p2, %p515_p3  ;;  %p537_p6 = scmp.lt.s32.totalorder %s535_s5, %s528_s28 }
  0x27   : > { %p532_p11 = pneg %p531_p4  ;;  %p538_p7 = por %p537_p6, %p536_p9 }
  0x29   : > { %p539_p10 = pnand %p538_p7, %p532_p11 }
  0x2b   : > { %542 = shalt.err (!%p539_p10)
}
  0x2c   : > { %s628_s6 = smov 128   ;;  %s629_s8 = smov 8  }
  0x2d   : > { %450 = dma.hbm_to_vmem [thread:$0]  (!%p720_p0), %s727_s7, 384, %s729_s9, %s732_s10, %s628_s6, %s628_s6, %s629_s8  }
  0x2e   : > { %p173_p12 = scmp.lt.s32.totalorder %s625_s17, 3  ;;  %p850_p1 = scmp.ge.s32.totalorder %s625_s17, 1 }
  0x30   : > { %p174_p3 = pnand %p850_p1, %p173_p12 }
  0x31   : > { %s764_s11 = sand.u32 (!%p174_p3), 1, %s609_s13  }
  0x32   : > { %177 = sbr.rel (%p174_p3) target bundleno = 325 (0x145), region = 32  ;;  %s180_s19 = scalar_lea.sflag (!%p174_p3), [#allocation3], %s764_s11 }
  0x33   : > { %s442_s18 = smul.u32 (!%p174_p3), 24, %s764_s11 }
  0x35   : > { %s183_s21 = scalar_lea.vmem (!%p174_p3), [#allocation2], %s442_s18 }
  0x39   : > { %596 = dma.done.wait (%p699_p8), %s180_s19, 384  }
  0x3a   : > { %598 = vsyncadd (%p699_p8), %s180_s19, 4294966912  ;;  %v630_v0 = vmov 0   ;;  %vm223_vm0 = vcmask 195584   ;;  %v206_v1 = vld [vmem:[%s183_s21] sm:$0xff]  ;;  %v207_v2 = vld [vmem:[%s183_s21 + $0x8] sm:$0xff]  ;;  %s415_s29 = sshll.u32 %s764_s11, 3 }
  0x3b   : > { %508 = vset.pattern.permute.xlu0 %v630_v0  ;;  %v436_v3 = vpack.c.bf16 %v207_v2, %v206_v1  ;;  %v209_v4 = vld [vmem:[%s841_s1] sm:$0xff]  ;;  %v212_v5 = vld [vmem:[%s842_s2 + $0x8] sm:$0xff]  ;;  %s419_s30 = sshll.u32 %s617_s15, 7  ;;  %s205_s5 = scalar_lea.vmem [#allocation5], %s415_s29 }
  0x3c   : > { %v208_v6 = vld [vmem:[%s183_s21 + $0x10] sm:$0xff]  ;;  %433 = vmatprep.mubr.msk.f32.mxu0 %vm223_vm0, %v209_v4  ;;  %220 = vperm.xlu0 %508, %v212_v5   ;;  %v211_v7 = vld [vmem:[%s842_s2] sm:$0xff]  ;;  %s328_s6 = sshll.u32 %s205_s5, 4  ;;  %s791_s19 = scalar_lea.hbm %s843_s3, %s419_s30  ;;  %s793_s6 = int_to_ptr.vmem [resolvable:$true] %s328_s6 }
  0x3d   : > { %437 = vmatprep.subr.bf16.mxu0 %v436_v3  ;;  %v210_v8 = vld [vmem:[%s841_s1 + $0x8] sm:$0xff]  ;;  %s314_s21 = scalar_lea.sflag [#allocation4], %s764_s11  ;;  %s543_s4 = scalar_lea.vmem %s793_s6, 128 }
  0x3e   : > { %439 = vmatpush3.bf16.msra.mxu0 %v436_v3  ;;  %p544_p8 = scmp.ne.s32.totalorder %s793_s6, %s543_s4  ;;  %p851_p9 = scmp.ne.s32.totalorder %s847_s25, 0 }
  0x3f   : > { %431 = vmatprep.subr.mxu0 %v208_v6  ;;  %s631_s15 = smov [#allocation5]  }
  0x40   : > { %215 = vperm.xlu0 %508, %v211_v7   ;;  %p545_p11 = pnand %p544_p8, %p851_p9  ;;  %s547_s7 = sshll.u32 %s631_s15, 4  ;;  %s548_s7 = int_to_ptr.vmem [resolvable:$false] %s547_s7 }
  0x41   : > { %s549_s9 = scalar_lea.vmem %s548_s7, 256  ;;  %p550_p5 = scmp.lt.s32.totalorder %s793_s6, %s548_s7 }
  0x42   : > { %432 = vmatpush3.msra.mxu0 %v208_v6  ;;  %p546_p0 = pneg %p545_p11  ;;  %p551_p13 = scmp.lt.s32.totalorder %s549_s9, %s543_s4 }
  0x43   : > { %434 = vmatmul.mubr.msk.f32.vlgmr.msra.gmra.mrb[0].mxu0 %vm223_vm0, %v210_v8 }
  0x44   : > { %p552_p2 = por %p551_p13, %p550_p5 }
  0x46   : > { %p553_p4 = pnand %p552_p2, %p546_p0 }
  0xbb   : > { %v221_v9 = vpop.permute.xlu0 %220 }
  0xbf   : > { %v216_v17 = vpop.permute.xlu0 %215 }
 0x116   : > { %v435_v10 = vpop.f32.mrb[0].mxu0 }
 0x117   : > { %v302_v11 = vadd.f32 %v435_v10, %v221_v9  ;;  %v296_v12 = vpop.f32.mrb[1].mxu0 }
 0x118   : > { %v297_v18 = vadd.f32 %v296_v12, %v216_v17 }
 0x119   : > { %v305_v13 = vsub.f32 0.0, %v302_v11 }
 0x11b   : > { %v306_v14 = vmul.f32 1.442695, %v305_v13 }
 0x11d   : > { %509 = vpow2.f32 %v306_v14 }
 0x127   : > { %v510_v15 = vpop.eup %509 }
 0x128   : > { %v308_v16 = vadd.f32 1.0, %v510_v15 }
 0x12a   : > { %511 = vrcp.f32 %v308_v16 }
 0x134   : > { %v512_v19 = vpop.eup %511 }
 0x135   : > { %v311_v20 = vmul.f32 %v512_v19, %v297_v18 }
 0x137   : > { %312 = vst [vmem:[%s205_s5] sm:$0xff] %v311_v20 }
 0x138   : > { %556 = shalt.err (!%p553_p4)
}
 0x139   : > { %s557_s11 = scalar_lea.hbm %s791_s19, 128  ;;  %s561_s22 = scalar_lea.hbm %s843_s3, 256 }
 0x13a   : > { %p558_p6 = scmp.ne.s32.totalorder %s791_s19, %s557_s11  ;;  %p562_p12 = scmp.lt.u32.totalorder %s791_s19, %s843_s3 }
 0x13b   : > { %p563_p1 = scmp.lt.u32.totalorder %s561_s22, %s557_s11  ;;  %p565_p8 = scmp.lt.u32.totalorder %s557_s11, %s791_s19 }
 0x13c   : > { %p559_p7 = pnand %p558_p6, %p851_p9 }
 0x13d   : > { %p564_p3 = por %p563_p1, %p562_p12 }
 0x13e   : > { %p560_p10 = pneg %p559_p7 }
 0x13f   : > { %p566_p11 = por %p565_p8, %p564_p3 }
 0x141   : > { %p567_p0 = pnand %p566_p11, %p560_p10 }
 0x143   : > { %570 = shalt.err (!%p567_p0)
}
 0x144   : > { %445 = dma.vmem_to_hbm [thread:$0]  (%p851_p9), %s793_s6, 128, %s791_s19, %s314_s21  }
 0x145 PF: > { %s340_s29 = sand.u32 1, %s605_s12   ;;  %p852_p5 = scmp.ne.s32.totalorder %s848_s27, 0 }
 0x146   : > { %p853_p13 = scmp.ge.s32.totalorder %s625_s17, 2  ;;  %s341_s30 = scalar_lea.sflag [#allocation4], %s340_s29 }
 0x148   : > { %p452_p2 = pnand %p853_p13, %p852_p5 }
 0x14a   : > { %600 = dma.done.wait (!%p452_p2), %s341_s30, 128  }
 0x14b   : > { %602 = vsyncadd (!%p452_p2), %s341_s30, 4294967168  ;;  %s19_s17 = sadd.s32 1, %s625_s17   ;;  %s854_s12 = smov %s609_s13 }
 0x14c   : > { %p16_p4 = scmp.ge.s32.totalorder %s19_s17, 4   ;;  %s855_s13 = smov %s613_s14 }
 0x14d   : > { %s856_s14 = smov %s708_s26  ;;  %s857_s15 = smov %s621_s16 }
 0x14e   : > { %s858_s16 = smov %s860_s20  ;;  %18 = sbr.rel (!%p16_p4) target bundleno = 6 (0x6), region = 77 }
 0x155   :  { %346 = vsyncpa [#allocation3], 1 }
 0x156   :  { %348 = vsyncpa [#allocation3 + $0x1], 1 }
 0x157   :  { %349 = vsyncpa [#allocation4], 1 }
 0x158   :  { %351 = vsyncpa [#allocation4 + $0x1], 1 }

</bundles_post_ra>
